<compile_context>
chip_gen: v7x
topology: tpu7x:2x2x1
jax: 0.10.0
libtpu: 0.0.40
codegen_flags: <defaults>
</compile_context>

<pallas_src>
import math
from functools import partial

import jax
import jax.numpy as jnp
from jax.experimental import pallas as pl
from jax.experimental.pallas import tpu as pltpu


LANE_CHOICES = (512, 256, 128)   # lane-dense last dim; prefer the largest that divides n
DEFAULT_BLOCK_ROWS = 2048        # 2048 x 512 x f32 = 4 MiB per plane per pipeline buffer
MIN_BLOCK_ROWS = 256             # floor: tiny tiles are all per-step overhead
VMEM_LIMIT_BYTES = 48 * 1024 * 1024   # v7x has 64 MiB/TC; leave headroom for scratch


def _leaky(x, negative_slope):
    """LeakyReLU, specialized at trace time when the slope is exactly 0."""
    if negative_slope == 0.0:
        return jnp.maximum(x, 0.0)
    return jnp.where(x >= 0.0, x, negative_slope * x)


def _complex_relu_kernel(zr_ref, zi_ref, or_ref, oi_ref,
                         *, mode, negative_slope, bias, cos_b, sin_b):
    """Elementwise complex activation on one (block_rows, lanes) tile.

    zr_ref / zi_ref: real and imaginary planes of z.
    or_ref / oi_ref: real and imaginary planes of the output.
    Scalars (bias, cos_b, sin_b, negative_slope) are compile-time constants.
    """
    zr = zr_ref[...]
    zi = zi_ref[...]
    ns = negative_slope

    if mode == "cartesian":
        # LeakyReLU applied independently to real and imaginary parts.
        or_ref[...] = _leaky(zr, ns)
        oi_ref[...] = _leaky(zi, ns)

    elif mode == "real":
        # LeakyReLU on the real part only, imaginary part passes through.
        or_ref[...] = _leaky(zr, ns)
        oi_ref[...] = zi

    elif mode == "modulus":
        # torch: (|z| + bias) * z / |z| where |z| + bias > 0, else 0.
        r2 = zr * zr + zi * zi
        zabs = jnp.sqrt(r2)
        shifted = zabs + bias
        cond = shifted > 0.0
        # max() guard: returns 0 at z == 0 instead of NaN (see module TODO).
        factor = shifted / jnp.maximum(zabs, 1e-30)
        or_ref[...] = jnp.where(cond, zr * factor, 0.0)
        oi_ref[...] = jnp.where(cond, zi * factor, 0.0)

    elif mode == "halfplane":
        # torch condition: 0 <= angle(z) - bias < pi/2.
        # Equivalent (exact for bias in [0, pi/2]) to a rotation by -bias:
        # w = z * exp(-i*bias); condition <=> Re(w) > 0 and Im(w) >= 0.
        wr = zr * cos_b + zi * sin_b
        wi = zi * cos_b - zr * sin_b
        cond = jnp.logical_and(wr > 0.0, wi >= 0.0)
        if ns == 0.0:
            or_ref[...] = jnp.where(cond, zr, 0.0)
            oi_ref[...] = jnp.where(cond, zi, 0.0)
        else:
            or_ref[...] = jnp.where(cond, zr, ns * zr)
            oi_ref[...] = jnp.where(cond, zi, ns * zi)

    else:
        raise NotImplementedError(mode)


def _choose_block_rows(rows, requested):
    """Sublane-aligned row-tile size: big blocks, >= 2 blocks for medium tensors."""
    if requested is not None:
        # Clamp user blocks to a sane floor (>= 512 KiB per plane per buffer).
        br = max(MIN_BLOCK_ROWS, (int(requested) // 8) * 8)
    else:
        br = DEFAULT_BLOCK_ROWS
    if rows <= br:
        if rows >= 2 * MIN_BLOCK_ROWS:
            # Medium tensor: split into two ~even blocks so both v7x
            # TensorCores get work and the DMA pipeline overlaps compute.
            br = ((((rows + 1) // 2) + 7) // 8) * 8
        else:
            # Small tensor: single full-extent block (always legal).
            br = rows
    return br


class ComplexReLU:
    """JAX/Pallas port of makani's ComplexReLU.

    Deterministic parameter init: bias = scale * ones(1) (scalar bias only)."""

    def __init__(self, negative_slope=0.0, mode="real", bias_shape=None, scale=1.0,
                 block_rows=None):
        if mode not in ("cartesian", "modulus", "halfplane", "real"):
            raise NotImplementedError(mode)
        self.mode = mode
        self.negative_slope = float(negative_slope)
        if mode in ("modulus", "halfplane"):
            # scalar bias init (bias_shape is ignored, see module TODO)
            self.bias = float(scale)
        else:
            self.bias = 0.0
        self.block_rows = block_rows

    def __call__(self, z: jax.Array) -> jax.Array:
        assert jnp.iscomplexobj(z), "ComplexReLU expects a complex input"
        orig_shape = z.shape
        n = 1
        for d in orig_shape:
            n *= int(d)

        # Pick the largest lane width that divides n so the common (aligned)
        # case needs no pad / slice round trip.
        lanes = None
        for cand in LANE_CHOICES:
            if n % cand == 0:
                lanes = cand
                break
        if lanes is None:
            lanes = LANE_CHOICES[0]
        rows = -(-n // lanes)
        pad = rows * lanes - n

        zr = jnp.real(z).astype(jnp.float32).reshape(-1)
        zi = jnp.imag(z).astype(jnp.float32).reshape(-1)
        if pad:
            zr = jnp.pad(zr, (0, pad))
            zi = jnp.pad(zi, (0, pad))
        zr = zr.reshape(rows, lanes)
        zi = zi.reshape(rows, lanes)

        br = _choose_block_rows(rows, self.block_rows)
        num_blocks = pl.cdiv(rows, br)

        kernel = partial(
            _complex_relu_kernel,
            mode=self.mode,
            negative_slope=self.negative_slope,
            bias=self.bias,
            cos_b=math.cos(self.bias),
            sin_b=math.sin(self.bias),
        )

        n_elems = rows * lanes
        cost = pl.CostEstimate(
            flops=12 * n_elems,
            transcendentals=(n_elems if self.mode == "modulus" else 0),
            bytes_accessed=4 * n_elems * 4,   # 2 input + 2 output f32 planes
        )

        block = pl.BlockSpec((br, lanes), lambda i: (i, 0))
        out_r, out_i = pl.pallas_call(
            kernel,
            grid=(num_blocks,),
            out_shape=(
                jax.ShapeDtypeStruct((rows, lanes), jnp.float32),
                jax.ShapeDtypeStruct((rows, lanes), jnp.float32),
            ),
            in_specs=[block, block],
            out_specs=(block, block),
            # Donate the zr/zi temporaries as output buffers (elementwise op,
            # same blocking on both sides -> in-place is safe).
            input_output_aliases={0: 0, 1: 1},
            cost_estimate=cost,
            compiler_params=pltpu.CompilerParams(
                dimension_semantics=("parallel",),
                vmem_limit_bytes=VMEM_LIMIT_BYTES,
                # Fold the real/imag split (+ pad) producers into the kernel's
                # input DMA stream instead of materializing them in HBM.
                allow_input_fusion=[True, True],
            ),
        )(zr, zi)

        if pad:
            out_r = out_r.reshape(-1)[:n].reshape(orig_shape)
            out_i = out_i.reshape(-1)[:n].reshape(orig_shape)
        else:
            out_r = out_r.reshape(orig_shape)
            out_i = out_i.reshape(orig_shape)
        return jax.lax.complex(out_r, out_i)


def _reference(z, mode, negative_slope, bias):
    """Pure-JAX reference mirroring the PyTorch forward."""
    zr, zi = jnp.real(z), jnp.imag(z)
    lrelu = lambda x: jnp.where(x >= 0.0, x, negative_slope * x)
    if mode == "cartesian":
        return jax.lax.complex(lrelu(zr), lrelu(zi))
    if mode == "real":
        return jax.lax.complex(lrelu(zr), zi)
    if mode == "modulus":
        zabs = jnp.sqrt(zr * zr + zi * zi)
        shifted = zabs + bias
        return jnp.where(shifted > 0.0, shifted * z / zabs, 0.0 + 0.0j)
    if mode == "halfplane":
        ang = jnp.angle(z) - bias
        cond = jnp.logical_and(ang >= 0.0, ang < jnp.pi / 2.0)
        return jnp.where(cond, z, negative_slope * z)
    raise NotImplementedError(mode)


if __name__ == "__main__":
    key = jax.random.PRNGKey(0)

    # Shapes exercise: aligned single-block, padded tail, even 2-block split
    # (medium tensor / v7x megacore path), and a multi-block grid with a
    # masked partial last block.
    cases = [
        ((2, 4, 16, 16), None),     # n = 2048   -> lanes=512, rows=4, single block
        ((2, 3, 10, 10), None),     # n = 600    -> padded to 1024, rows=2
        ((4, 8, 128, 128), None),   # n = 524288 -> rows=1024, split into 2 even blocks
        ((5, 8, 128, 64), 256),     # n = 327680 -> rows=640, block_rows=256 -> 3 blocks
    ]
    configs = [
        dict(negative_slope=0.0, mode="real"),               # module defaults
        dict(negative_slope=0.1, mode="cartesian"),
        dict(negative_slope=0.0, mode="modulus", scale=1.0),
        dict(negative_slope=0.1, mode="halfplane", scale=0.5),
    ]

    for shape, block_rows in cases:
        key, kr, ki = jax.random.split(key, 3)
        zr = jax.random.normal(kr, shape, dtype=jnp.float32)
        zi = jax.random.normal(ki, shape, dtype=jnp.float32)
        z = jax.lax.complex(zr, zi)  # complex64, NCHW

        for cfg in configs:
            mod = ComplexReLU(block_rows=block_rows, **cfg)
            out = jax.block_until_ready(mod(z))
            ref = _reference(z, mod.mode, mod.negative_slope, mod.bias)
            assert out.shape == z.shape and out.dtype == jnp.complex64

            ok = bool(jnp.allclose(out, ref, atol=1e-5, rtol=1e-5))
            if not ok and mod.mode == "halfplane":
                # The rotation test and jnp.angle can disagree by float
                # rounding for points essentially ON the sector boundary;
                # tolerate classification flips only there.
                ang = jnp.angle(z) - mod.bias
                near = jnp.logical_or(jnp.abs(ang) < 1e-5,
                                      jnp.abs(ang - jnp.pi / 2.0) < 1e-5)
                mism = jnp.logical_not(
                    jnp.isclose(out, ref, atol=1e-5, rtol=1e-5))
                ok = bool(jnp.all(jnp.logical_or(jnp.logical_not(mism), near)))
            assert ok, f"mismatch in mode {mod.mode}, shape {shape}"

    print("KERNEL_OK")
</pallas_src>

<mosaic_0001>
module attributes {stable_mosaic.version = 11 : i64} {
  func.func @_complex_relu_kernel(%arg0: i32, %arg1: memref<4x512xf32, #tpu.memory_space<vmem>>, %arg2: memref<4x512xf32, #tpu.memory_space<vmem>>, %arg3: memref<4x512xf32, #tpu.memory_space<vmem>>, %arg4: memref<4x512xf32, #tpu.memory_space<vmem>>) attributes {dimension_semantics = [#tpu.dimension_semantics<parallel>], iteration_bounds = array<i64: 1>, scalar_prefetch = 0 : i64, scratch_operands = 0 : i64, tpu.core_type = #tpu.core_type<tc>, window_params = [{transform_indices = @transform_0, window_bounds = array<i64: 4, 512>}, {transform_indices = @transform_1, window_bounds = array<i64: 4, 512>}, {transform_indices = @transform_2, window_bounds = array<i64: 4, 512>}, {transform_indices = @transform_3, window_bounds = array<i64: 4, 512>}]} {
    %c0 = arith.constant 0 : index
    %c0_0 = arith.constant 0 : index
    %0 = vector.load %arg1[%c0, %c0_0] : memref<4x512xf32, #tpu.memory_space<vmem>>, vector<4x512xf32>
    %c0_1 = arith.constant 0 : index
    %c0_2 = arith.constant 0 : index
    %1 = vector.load %arg2[%c0_1, %c0_2] : memref<4x512xf32, #tpu.memory_space<vmem>>, vector<4x512xf32>
    %cst = arith.constant 0.000000e+00 : f32
    %2 = vector.broadcast %cst : f32 to vector<4x512xf32>
    %3 = arith.maximumf %0, %2 : vector<4x512xf32>
    %c0_3 = arith.constant 0 : index
    %c0_4 = arith.constant 0 : index
    %4 = vector.load %arg3[%c0_3, %c0_4] : memref<4x512xf32, #tpu.memory_space<vmem>>, vector<4x512xf32>
    tpu.vector_store %arg3[%c0_3, %c0_4], %3 {strides = array<i32>} : memref<4x512xf32, #tpu.memory_space<vmem>>, vector<4x512xf32>,
    %c0_5 = arith.constant 0 : index
    %c0_6 = arith.constant 0 : index
    %5 = vector.load %arg4[%c0_5, %c0_6] : memref<4x512xf32, #tpu.memory_space<vmem>>, vector<4x512xf32>
    tpu.vector_store %arg4[%c0_5, %c0_6], %1 {strides = array<i32>} : memref<4x512xf32, #tpu.memory_space<vmem>>, vector<4x512xf32>,
    return
  }
  func.func @transform_0(%arg0: i32) -> (i32, i32) {
    %c0_i32 = arith.constant 0 : i32
    %c0_i32_0 = arith.constant 0 : i32
    return %arg0, %c0_i32 : i32, i32
  }
  func.func @transform_1(%arg0: i32) -> (i32, i32) {
    %c0_i32 = arith.constant 0 : i32
    %c0_i32_0 = arith.constant 0 : i32
    return %arg0, %c0_i32 : i32, i32
  }
  func.func @transform_2(%arg0: i32) -> (i32, i32) {
    %c0_i32 = arith.constant 0 : i32
    %c0_i32_0 = arith.constant 0 : i32
    return %arg0, %c0_i32 : i32, i32
  }
  func.func @transform_3(%arg0: i32) -> (i32, i32) {
    %c0_i32 = arith.constant 0 : i32
    %c0_i32_0 = arith.constant 0 : i32
    return %arg0, %c0_i32 : i32, i32
  }
}

</mosaic_0001>

<bundles_post_ra>
// kernel: tpu_custom_call.1
= control target key start
LH: loop header
LB: loop body
LE: loop exit
PB: predicated region body
PF: predicated region fallthrough
CT: control target
= control target key end

     0   :  { %9 = vsyncpa [#allocation3], 0  ;;  %s258_s0 = inlined_call_operand.hbm [shape: f32[4,512], index: 0, kind: input, shape index: {}, may-alias: {0,2}]   ;;  %s259_s1 = inlined_call_operand.hbm [shape: f32[4,512], index: 1, kind: input, shape index: {}, may-alias: {1,3}]   ;;  %s260_s2 = inlined_call_operand.hbm [shape: f32[4,512], index: 2, kind: output, shape index: {0}, may-alias: {0,2}]   ;;  %s261_s3 = inlined_call_operand.hbm [shape: f32[4,512], index: 3, kind: output, shape index: {1}, may-alias: {1,3}]  }
   0x1   :  { %10 = vsyncpa [#allocation6], 0 }
   0x2   :  { %11 = vsyncpa [#allocation4], 0 }
   0x3   :  { %12 = vsyncpa [#allocation9], 0  ;;  %s179_s12 = smov [#allocation2]   ;;  %s180_s14 = smov [#allocation5]  }
   0x4   :  { %s19_s13 = sshll.u32 %s179_s12, 4  ;;  %s29_s15 = sshll.u32 %s180_s14, 4  ;;  %s20_s13 = int_to_ptr.vmem [resolvable:$true] %s19_s13  ;;  %s30_s15 = int_to_ptr.vmem [resolvable:$true] %s29_s15 }
   0x5   :  { %s83_s18 = scalar_lea.hbm %s258_s0, 256 }
   0x6   :  { %p84_p0 = scmp.ne.s32.totalorder %s258_s0, %s83_s18  ;;  %p87_p1 = scmp.lt.u32.totalorder %s83_s18, %s258_s0 }
   0x8   :  { %p89_p2 = pnand %p87_p1, %p84_p0 }
   0xa   :  { %92 = shalt.err (!%p89_p2)
}
   0xb   :  { %s93_s23 = scalar_lea.vmem %s20_s13, 256  ;;  %p98_p4 = scmp.lt.s32.totalorder %s20_s13, %s20_s13 }
   0xc   :  { %p94_p3 = scmp.ne.s32.totalorder %s20_s13, %s93_s23  ;;  %p99_p5 = scmp.lt.s32.totalorder %s93_s23, %s93_s23 }
   0xe   :  { %p100_p6 = por %p99_p5, %p98_p4 }
  0x10   :  { %p101_p7 = pnand %p100_p6, %p94_p3 }
  0x12   :  { %104 = shalt.err (!%p101_p7)
}
  0x13   :  { %22 = dma.hbm_to_vmem [thread:$0]  %s258_s0, 256, %s20_s13, [#allocation3]  }
  0x14   :  { %s105_s28 = scalar_lea.hbm %s259_s1, 256 }
  0x15   :  { %p106_p8 = scmp.ne.s32.totalorder %s259_s1, %s105_s28  ;;  %p109_p9 = scmp.lt.u32.totalorder %s105_s28, %s259_s1 }
  0x17   :  { %p111_p10 = pnand %p109_p9, %p106_p8 }
  0x19   :  { %114 = shalt.err (!%p111_p10)
}
  0x1a   :  { %s115_s6 = scalar_lea.vmem %s30_s15, 256  ;;  %p120_p12 = scmp.lt.s32.totalorder %s30_s15, %s30_s15 }
  0x1b   :  { %p116_p11 = scmp.ne.s32.totalorder %s30_s15, %s115_s6  ;;  %p121_p13 = scmp.lt.s32.totalorder %s115_s6, %s115_s6 }
  0x1d   :  { %p122_p0 = por %p121_p13, %p120_p12 }
  0x1f   :  { %p123_p1 = pnand %p122_p0, %p116_p11 }
  0x21   :  { %126 = shalt.err (!%p123_p1)
}
  0x22   :  { %32 = dma.hbm_to_vmem [thread:$0]  %s259_s1, 256, %s30_s15, [#allocation6]  }
  0x23   :  { %171 = dma.done.wait [#allocation3], 256  }
  0x24   :  { %172 = vsyncadd [#allocation3], 4294967040 }
  0x25   :  { %173 = dma.done.wait [#allocation6], 256  }
  0x26   :  { %174 = vsyncadd [#allocation6], 4294967040  ;;  %s181_s8 = smov [#allocation8]   ;;  %s182_s10 = smov [#allocation7]   ;;  %v39_v0 = vld [vmem:[#allocation2] sm:$0xff]  ;;  %v40_v1 = vld [vmem:[#allocation2 + $0x8] sm:$0xff] }
  0x27   :  { %s65_s9 = sshll.u32 %s181_s8, 4  ;;  %s55_s11 = sshll.u32 %s182_s10, 4  ;;  %v41_v2 = vld [vmem:[#allocation5] sm:$0xff]  ;;  %v43_v3 = vmax.f32 %v39_v0, 0.0  ;;  %v44_v4 = vmax.f32 %v40_v1, 0.0  ;;  %v42_v5 = vld [vmem:[#allocation5 + $0x8] sm:$0xff]  ;;  %s66_s9 = int_to_ptr.vmem [resolvable:$true] %s65_s9  ;;  %s227_s11 = int_to_ptr.vmem [resolvable:$true] %s55_s11 }
  0x28   :  { %47 = vst [vmem:[#allocation8] sm:$0xff] %v41_v2  ;;  %48 = vst [vmem:[#allocation8 + $0x8] sm:$0xff] %v42_v5  ;;  %s127_s1 = scalar_lea.vmem %s66_s9, 256  ;;  %p132_p3 = scmp.lt.s32.totalorder %s66_s9, %s66_s9 }
  0x29   :  { %45 = vst [vmem:[#allocation7] sm:$0xff] %v43_v3  ;;  %46 = vst [vmem:[#allocation7 + $0x8] sm:$0xff] %v44_v4  ;;  %p128_p2 = scmp.ne.s32.totalorder %s66_s9, %s127_s1  ;;  %p133_p4 = scmp.lt.s32.totalorder %s127_s1, %s127_s1 }
  0x2b   :  { %p134_p5 = por %p133_p4, %p132_p3 }
  0x2d   :  { %p135_p6 = pnand %p134_p5, %p128_p2 }
  0x2f   :  { %138 = shalt.err (!%p135_p6)
}
  0x30   :  { %s139_s14 = scalar_lea.hbm %s261_s3, 256 }
  0x31   :  { %p140_p7 = scmp.ne.s32.totalorder %s261_s3, %s139_s14  ;;  %p143_p8 = scmp.lt.u32.totalorder %s139_s14, %s261_s3 }
  0x33   :  { %p145_p9 = pnand %p143_p8, %p140_p7 }
  0x35   :  { %148 = shalt.err (!%p145_p9)
}
  0x36   :  { %68 = dma.vmem_to_hbm [thread:$0]  %s66_s9, 256, %s261_s3, [#allocation9]  }
  0x37   :  { %s149_s21 = scalar_lea.vmem %s227_s11, 256  ;;  %p154_p11 = scmp.lt.s32.totalorder %s227_s11, %s227_s11 }
  0x38   :  { %p150_p10 = scmp.ne.s32.totalorder %s227_s11, %s149_s21  ;;  %p155_p12 = scmp.lt.s32.totalorder %s149_s21, %s149_s21 }
  0x3a   :  { %p156_p13 = por %p155_p12, %p154_p11 }
  0x3c   :  { %p157_p0 = pnand %p156_p13, %p150_p10 }
  0x3e   :  { %160 = shalt.err (!%p157_p0)
}
  0x3f   :  { %s161_s24 = scalar_lea.hbm %s260_s2, 256 }
  0x40   :  { %p162_p1 = scmp.ne.s32.totalorder %s260_s2, %s161_s24  ;;  %p165_p2 = scmp.lt.u32.totalorder %s161_s24, %s260_s2 }
  0x42   :  { %p167_p3 = pnand %p165_p2, %p162_p1 }
  0x44   :  { %170 = shalt.err (!%p167_p3)
}
  0x45   :  { %58 = dma.vmem_to_hbm [thread:$0]  %s227_s11, 256, %s260_s2, [#allocation4]  }
  0x46   :  { %175 = dma.done.wait [#allocation4], 256  }
  0x47   :  { %176 = vsyncadd [#allocation4], 4294967040 }
  0x48   :  { %177 = dma.done.wait [#allocation9], 256  }
  0x49   :  { %178 = vsyncadd [#allocation9], 4294967040 }
  0x4a   :  { %75 = vsyncpa [#allocation3], 1 }
  0x4b   :  { %76 = vsyncpa [#allocation6], 1 }
  0x4c   :  { %77 = vsyncpa [#allocation4], 1 }
  0x4d   :  { %78 = vsyncpa [#allocation9], 1 }

</bundles_post_ra>
